<compile_context>
chip_gen: v5e
topology: v5e:2x2
jax: 0.10.0
libtpu: 0.0.40
codegen_flags: <defaults>
</compile_context>

<pallas_src>
import functools

import jax
import jax.numpy as jnp
from jax.experimental import pallas as pl
from jax.experimental.pallas import tpu as pltpu


def _round_up(x, m):
    return ((x + m - 1) // m) * m


# --------------------------------------------------------------------------- #
# Kernel
# --------------------------------------------------------------------------- #
def bc_vae_kernel(sa_ref, eps_ref, wfront_ref, w2_ref, w4z_ref, w5_ref,
                  whead_ref, b_ref, out_ref, *, na, nl, nh, ow):
    f32, bf16 = jnp.float32, jnp.bfloat16

    sa = sa_ref[...]                       # (bt, ns+na) bf16 (cast in wrapper)
    eps = eps_ref[...]                     # (bt, nl)    f32

    # Packed biases (f32): rows = [b1, b2, bm|bs, b4, b5, b6|b7, 0, 0]
    b1 = b_ref[0:1, :nh]
    b2 = b_ref[1:2, :nh]
    bms = b_ref[2:3, :2 * nl]
    b4 = b_ref[3:4, :nh]
    b5 = b_ref[4:5, :nh]
    bas = b_ref[5:6, :2 * na]

    # Fused head weights: [wm | ws | w6 | w7] -> (nh, 2*nl + 2*na).
    # NOTE: the 2*nl split point assumes nl is a multiple of the bf16 sublane
    # pack (16); pad in pack_bc_vae_params if other configs are used.
    whead = whead_ref[...]
    wms = whead[:, :2 * nl]                # encoder heads (mean | log_var)
    was = whead[:, 2 * nl:]                # decoder heads (fc6  | fc7)

    # ---- fused front matmul: sa @ [w1 | pad(w4_state)] -> [h_pre | d_state]
    # One N=2*nh MXU push instead of two latency-chained skinny dots; the
    # split at lane nh (=128) is aligned and free.
    front = jnp.dot(sa, wfront_ref[...], preferred_element_type=f32)
    h = jnp.maximum(front[:, :nh] + b1, 0.0).astype(bf16)
    d_state = front[:, nh:] + b4           # state-only decoder term (f32)

    # ---- encoder chain ----
    h = jnp.dot(h, w2_ref[...], preferred_element_type=f32) + b2
    h = jnp.maximum(h, 0.0).astype(bf16)

    # Fused mean|log_var head: one dot instead of two.
    ms = jnp.dot(h, wms, preferred_element_type=f32) + bms       # (bt, 2*nl)
    mu = ms[:, :nl]
    log_var = ms[:, nl:]

    # ---- reparameterize (f32 elementwise) ----
    z = (mu + eps * jnp.exp(log_var * 0.5)).astype(bf16)

    # ---- decode: cat([z, state]) @ W4 == z @ w4_z + state @ w4_state (fused above)
    d = jnp.dot(z, w4z_ref[...], preferred_element_type=f32) + d_state
    d = jnp.maximum(d, 0.0).astype(bf16)
    d = jnp.dot(d, w5_ref[...], preferred_element_type=f32) + b5
    d = jnp.maximum(d, 0.0).astype(bf16)

    # Fused fc6|fc7 head: one dot instead of two.
    head = jnp.dot(d, was, preferred_element_type=f32) + bas     # (bt, 2*na)
    amean = head[:, :na]
    pre = head[:, na:]
    # numerically stable softplus, matching F.softplus
    asig = jnp.maximum(pre, 0.0) + jnp.log1p(jnp.exp(-jnp.abs(pre)))

    # Single lane-dense output slab:
    #   [mu | log_var | action_mean | action_sigma | zero-pad] -> (bt, ow)
    # One full-width concatenate + one unmasked store (do not split into
    # per-piece partial stores).
    pieces = [ms, amean, asig]
    pad = ow - (2 * nl + 2 * na)
    if pad:
        pieces.append(jnp.zeros((ms.shape[0], pad), f32))
    out_ref[...] = jnp.concatenate(pieces, axis=-1)


# --------------------------------------------------------------------------- #
# Parameters
# --------------------------------------------------------------------------- #
def make_bc_vae_params(key, num_state, num_action, num_hidden, num_latent):
    """Logical f32 params mimicking nn.Linear init, stored as [in, out]."""
    def lin(k, fan_in, fan_out):
        kw, kb = jax.random.split(k)
        bound = 1.0 / (fan_in ** 0.5)
        w = jax.random.uniform(kw, (fan_in, fan_out), jnp.float32, -bound, bound)
        b = jax.random.uniform(kb, (fan_out,), jnp.float32, -bound, bound)
        return w, b

    keys = jax.random.split(key, 8)
    w1, b1 = lin(keys[0], num_state + num_action, num_hidden)
    w2, b2 = lin(keys[1], num_hidden, num_hidden)
    wm, bm = lin(keys[2], num_hidden, num_latent)
    ws, bs = lin(keys[3], num_hidden, num_latent)
    w4, b4 = lin(keys[4], num_latent + num_state, num_hidden)
    w5, b5 = lin(keys[5], num_hidden, num_hidden)
    w6, b6 = lin(keys[6], num_hidden, num_action)
    w7, b7 = lin(keys[7], num_hidden, num_action)
    return dict(w1=w1, b1=b1, w2=w2, b2=b2, wm=wm, bm=bm, ws=ws, bs=bs,
                w4=w4, b4=b4, w5=w5, b5=b5, w6=w6, b6=b6, w7=w7, b7=b7)


def pack_bc_vae_params(params):
    """Kernel-ready params: bf16 fused weights + one packed f32 bias slab."""
    nh = params["w2"].shape[0]
    nl = params["wm"].shape[1]
    na = params["w6"].shape[1]
    n_in = params["w1"].shape[0]           # ns + na
    ns = params["w4"].shape[0] - nl
    bw = _round_up(max(nh, 2 * nl, 2 * na), 128)
    bf16 = jnp.bfloat16

    def row(vecs):
        v = jnp.concatenate([jnp.ravel(x) for x in vecs])
        return jnp.pad(v, (0, bw - v.shape[0]))

    bias = jnp.stack([
        row([params["b1"]]),
        row([params["b2"]]),
        row([params["bm"], params["bs"]]),
        row([params["b4"]]),
        row([params["b5"]]),
        row([params["b6"], params["b7"]]),
        jnp.zeros((bw,), jnp.float32),
        jnp.zeros((bw,), jnp.float32),
    ]).astype(jnp.float32)

    # fc4 weight split: z-rows stay a standalone matmul operand; state-rows are
    # fused into the front weight (zero rows for the action lanes of sa).
    w4z = params["w4"][:nl, :]                               # (nl, nh)
    w4s = params["w4"][nl:, :]                               # (ns, nh)
    w4s_pad = jnp.concatenate(
        [w4s, jnp.zeros((n_in - ns, nh), params["w4"].dtype)], axis=0)
    # Fused front weight: [w1 | pad(w4_state)] -> (ns+na, 2*nh)
    wfront = jnp.concatenate([params["w1"], w4s_pad], axis=1)

    # Fused head weights: [wm | ws | w6 | w7] -> (nh, 2*nl + 2*na)
    whead = jnp.concatenate(
        [params["wm"], params["ws"], params["w6"], params["w7"]], axis=1)

    return dict(
        wfront=wfront.astype(bf16),
        w2=params["w2"].astype(bf16),
        w4z=w4z.astype(bf16),
        w5=params["w5"].astype(bf16),
        whead=whead.astype(bf16),
        bias=bias,
    )


# --------------------------------------------------------------------------- #
# Wrapper
# --------------------------------------------------------------------------- #
def _resident_spec(shape):
    """Grid-invariant input: constant index_map; single buffer when supported."""
    index_map = lambda i: (0, 0)
    try:
        return pl.BlockSpec(shape, index_map, pipeline_mode=pl.Buffered(1))
    except (TypeError, AttributeError):     # older jax without pipeline_mode
        return pl.BlockSpec(shape, index_map)


def bc_vae_forward(state, action, eps, packed, *, batch_tile=None):
    B, ns = state.shape
    na = action.shape[1]
    nl = eps.shape[1]
    nh = packed["w2"].shape[0]
    ow = _round_up(2 * nl + 2 * na, 128)     # lane-dense packed output width

    if batch_tile is None:
        bt = min(_round_up(B, 8), 1024)
        # v7x has 2 TensorCores: the "parallel" batch grid only shards across
        # them if there are >= 2 grid steps, so cap the tile at ~ceil(B/2)
        # (rounded to 16 for bf16-row alignment) once there is enough work.
        if B >= 32:
            bt = min(bt, _round_up(pl.cdiv(B, 2), 16))
    else:
        bt = max(8, _round_up(batch_tile, 8))
    b_pad = _round_up(B, bt)
    if b_pad > bt and bt % 16:
        # bf16 input tiles want 16-row alignment when the batch is split.
        bt = _round_up(bt, 16)
        b_pad = _round_up(B, bt)

    # state||action cast to bf16 here (it is only a matmul LHS): halves the
    # largest per-step input DMA.  eps stays f32 for the reparameterization.
    sa = jnp.concatenate([state, action], axis=1).astype(jnp.bfloat16)
    eps_p = eps.astype(jnp.float32)
    if b_pad != B:
        sa = jnp.pad(sa, ((0, b_pad - B), (0, 0)))
        eps_p = jnp.pad(eps_p, ((0, b_pad - B), (0, 0)))
    # TODO(synk): for very large memory-bound batches, pass state/action as two
    # separate inputs (skip the HBM-materialized concat) and fold the extra
    # K=na term into the front matmul; at small B latency dominates so the
    # single concatenated slab is kept.

    ordered = (sa, eps_p, packed["wfront"], packed["w2"], packed["w4z"],
               packed["w5"], packed["whead"], packed["bias"])

    def batch_map(i):
        return (i, 0)

    in_specs = [
        pl.BlockSpec((bt, ns + na), batch_map),
        pl.BlockSpec((bt, nl), batch_map),
        _resident_spec(packed["wfront"].shape),
        _resident_spec(packed["w2"].shape),
        _resident_spec(packed["w4z"].shape),
        _resident_spec(packed["w5"].shape),
        _resident_spec(packed["whead"].shape),
        _resident_spec(packed["bias"].shape),
    ]
    out_spec = pl.BlockSpec((bt, ow), batch_map)
    out_shape = jax.ShapeDtypeStruct((b_pad, ow), jnp.float32)

    flops = 2 * b_pad * ((ns + na) * 2 * nh + nh * nh + nh * 2 * nl
                         + nl * nh + nh * nh + nh * 2 * na)
    bytes_accessed = int(sum(int(a.size) * a.dtype.itemsize for a in ordered)
                         + b_pad * ow * 4)
    cost = pl.CostEstimate(flops=int(flops),
                           transcendentals=int(b_pad * (nl + 2 * na)),
                           bytes_accessed=bytes_accessed)

    # Scoped-VMEM: only override the default when the footprint could exceed
    # v5e's 16 MiB default (large user-supplied batch tiles).
    resident_bytes = sum(int(packed[k].size) * packed[k].dtype.itemsize
                         for k in ("wfront", "w2", "w4z", "w5", "whead", "bias"))
    stream_bytes = 2 * bt * ((ns + na) * 2 + nl * 4 + ow * 4)   # dbl-buffered I/O
    interm_bytes = bt * (2 * nh + nh + 2 * nl + nl + nh + nh + 2 * na + ow) * 4
    vmem_est = resident_bytes + stream_bytes + interm_bytes
    compiler_kwargs = dict(dimension_semantics=("parallel",))
    if vmem_est > 12 * 1024 * 1024:
        compiler_kwargs["vmem_limit_bytes"] = int(min(2 * vmem_est, 64 * 1024 * 1024))

    kernel = functools.partial(bc_vae_kernel, na=na, nl=nl, nh=nh, ow=ow)

    out = pl.pallas_call(
        kernel,
        out_shape=out_shape,
        grid=(b_pad // bt,),
        in_specs=in_specs,
        out_specs=out_spec,
        compiler_params=pltpu.CompilerParams(**compiler_kwargs),
        cost_estimate=cost,
    )(*ordered)

    out = out[:B]
    mu = out[:, :nl]
    log_var = out[:, nl:2 * nl]
    amean = out[:, 2 * nl:2 * nl + na]
    asigma = out[:, 2 * nl + na:2 * nl + 2 * na]
    return amean, asigma, mu, log_var


# --------------------------------------------------------------------------- #
# Pure-JAX reference (matches the kernel's bf16-matmul / f32-accumulate math;
# the self-test bounds deviation from this bf16 model, not the f32 original).
# --------------------------------------------------------------------------- #
def bc_vae_reference(state, action, eps, params):
    bf16 = jnp.bfloat16
    mm = lambda x, w: jnp.dot(x.astype(bf16), w.astype(bf16),
                              preferred_element_type=jnp.float32)
    relu = lambda v: jnp.maximum(v, 0.0)

    x = jnp.concatenate([state, action], axis=1)
    h = relu(mm(x, params["w1"]) + params["b1"])
    h = relu(mm(h, params["w2"]) + params["b2"])
    mu = mm(h, params["wm"]) + params["bm"]
    log_var = mm(h, params["ws"]) + params["bs"]
    z = mu + eps * jnp.exp(0.5 * log_var)
    xd = jnp.concatenate([z, state], axis=1)
    d = relu(mm(xd, params["w4"]) + params["b4"])
    d = relu(mm(d, params["w5"]) + params["b5"])
    amean = mm(d, params["w6"]) + params["b6"]
    asigma = jax.nn.softplus(mm(d, params["w7"]) + params["b7"])
    return amean, asigma, mu, log_var


if __name__ == "__main__":
    # small shapes consistent with the module's forward
    NUM_STATE, NUM_ACTION, NUM_HIDDEN, NUM_LATENT = 16, 8, 128, 16

    key = jax.random.PRNGKey(0)
    k_params, k_data = jax.random.split(key)
    params = make_bc_vae_params(k_params, NUM_STATE, NUM_ACTION,
                                NUM_HIDDEN, NUM_LATENT)
    packed = pack_bc_vae_params(params)

    # TODO(synk): torch.randn_like noise is sampled host-side with jax.random
    # (deterministic PRNGKey) and passed in, rather than in-kernel PRNG.
    for B in (8, 40):   # B=8: single grid step; B=40: multi-step grid + padding
        ks, ka, ke, k_data = jax.random.split(k_data, 4)
        state = jax.random.normal(ks, (B, NUM_STATE), jnp.float32)
        action = jax.random.normal(ka, (B, NUM_ACTION), jnp.float32)
        eps = jax.random.normal(ke, (B, NUM_LATENT), jnp.float32)

        outs = bc_vae_forward(state, action, eps, packed)
        outs = jax.block_until_ready(outs)

        refs = bc_vae_reference(state, action, eps, params)
        for o, r in zip(outs, refs):
            assert o.shape == r.shape and o.dtype == r.dtype
            assert jnp.allclose(o, r, atol=2e-3, rtol=2e-3), "mismatch vs reference"

    print("KERNEL_OK")
</pallas_src>

<mosaic_0001>
module attributes {stable_mosaic.version = 11 : i64} {
  func.func @bc_vae_kernel(%arg0: i32, %arg1: memref<8x24xbf16, #tpu.memory_space<vmem>>, %arg2: memref<8x16xf32, #tpu.memory_space<vmem>>, %arg3: memref<24x256xbf16, #tpu.memory_space<vmem>>, %arg4: memref<128x128xbf16, #tpu.memory_space<vmem>>, %arg5: memref<16x128xbf16, #tpu.memory_space<vmem>>, %arg6: memref<128x128xbf16, #tpu.memory_space<vmem>>, %arg7: memref<128x48xbf16, #tpu.memory_space<vmem>>, %arg8: memref<8x128xf32, #tpu.memory_space<vmem>>, %arg9: memref<8x128xf32, #tpu.memory_space<vmem>>) attributes {dimension_semantics = [#tpu.dimension_semantics<parallel>], iteration_bounds = array<i64: 1>, scalar_prefetch = 0 : i64, scratch_operands = 0 : i64, tpu.core_type = #tpu.core_type<tc>, window_params = [{transform_indices = @transform_0, window_bounds = array<i64: 8, 24>}, {transform_indices = @transform_1, window_bounds = array<i64: 8, 16>}, {pipeline_mode = #tpu.pipeline_mode<synchronous>, transform_indices = @transform_2, window_bounds = array<i64: 24, 256>}, {pipeline_mode = #tpu.pipeline_mode<synchronous>, transform_indices = @transform_3, window_bounds = array<i64: 128, 128>}, {pipeline_mode = #tpu.pipeline_mode<synchronous>, transform_indices = @transform_4, window_bounds = array<i64: 16, 128>}, {pipeline_mode = #tpu.pipeline_mode<synchronous>, transform_indices = @transform_5, window_bounds = array<i64: 128, 128>}, {pipeline_mode = #tpu.pipeline_mode<synchronous>, transform_indices = @transform_6, window_bounds = array<i64: 128, 48>}, {pipeline_mode = #tpu.pipeline_mode<synchronous>, transform_indices = @transform_7, window_bounds = array<i64: 8, 128>}, {transform_indices = @transform_8, window_bounds = array<i64: 8, 128>}]} {
    %c0 = arith.constant 0 : index
    %c0_0 = arith.constant 0 : index
    %0 = vector.load %arg1[%c0, %c0_0] : memref<8x24xbf16, #tpu.memory_space<vmem>>, vector<8x24xbf16>
    %c0_1 = arith.constant 0 : index
    %c0_2 = arith.constant 0 : index
    %1 = vector.load %arg2[%c0_1, %c0_2] : memref<8x16xf32, #tpu.memory_space<vmem>>, vector<8x16xf32>
    %c0_3 = arith.constant 0 : index
    %c0_4 = arith.constant 0 : index
    %2 = vector.load %arg8[%c0_3, %c0_4] : memref<8x128xf32, #tpu.memory_space<vmem>>, vector<1x128xf32>
    %c1 = arith.constant 1 : index
    %c0_5 = arith.constant 0 : index
    %3 = vector.load %arg8[%c1, %c0_5] : memref<8x128xf32, #tpu.memory_space<vmem>>, vector<1x128xf32>
    %c2 = arith.constant 2 : index
    %c0_6 = arith.constant 0 : index
    %4 = vector.load %arg8[%c2, %c0_6] : memref<8x128xf32, #tpu.memory_space<vmem>>, vector<1x32xf32>
    %c3 = arith.constant 3 : index
    %c0_7 = arith.constant 0 : index
    %5 = vector.load %arg8[%c3, %c0_7] : memref<8x128xf32, #tpu.memory_space<vmem>>, vector<1x128xf32>
    %c4 = arith.constant 4 : index
    %c0_8 = arith.constant 0 : index
    %6 = vector.load %arg8[%c4, %c0_8] : memref<8x128xf32, #tpu.memory_space<vmem>>, vector<1x128xf32>
    %c5 = arith.constant 5 : index
    %c0_9 = arith.constant 0 : index
    %7 = vector.load %arg8[%c5, %c0_9] : memref<8x128xf32, #tpu.memory_space<vmem>>, vector<1x16xf32>
    %c0_10 = arith.constant 0 : index
    %c0_11 = arith.constant 0 : index
    %8 = vector.load %arg7[%c0_10, %c0_11] : memref<128x48xbf16, #tpu.memory_space<vmem>>, vector<128x48xbf16>
    %9 = vector.extract_strided_slice %8 {offsets = [0, 0], sizes = [128, 32], strides = [1, 1]} : vector<128x48xbf16> to vector<128x32xbf16>
    %10 = vector.extract_strided_slice %8 {offsets = [0, 32], sizes = [128, 16], strides = [1, 1]} : vector<128x48xbf16> to vector<128x16xbf16>
    %c0_12 = arith.constant 0 : index
    %c0_13 = arith.constant 0 : index
    %11 = vector.load %arg3[%c0_12, %c0_13] : memref<24x256xbf16, #tpu.memory_space<vmem>>, vector<24x256xbf16>
    %cst = arith.constant dense<0.000000e+00> : vector<8x256xf32>
    %12 = tpu.matmul %0, %11, %cst {dimension_numbers = #tpu.dot_dimension_numbers<[1], [0], [0], [1], [0, 0, 1, 1], [], []>} : vector<8x24xbf16>, vector<24x256xbf16>, vector<8x256xf32> -> vector<8x256xf32>
    %13 = vector.extract_strided_slice %12 {offsets = [0, 0], sizes = [8, 128], strides = [1, 1]} : vector<8x256xf32> to vector<8x128xf32>
    %14 = vector.broadcast %2 : vector<1x128xf32> to vector<8x128xf32>
    %15 = arith.addf %13, %14 : vector<8x128xf32>
    %cst_14 = arith.constant 0.000000e+00 : f32
    %16 = vector.broadcast %cst_14 : f32 to vector<8x128xf32>
    %17 = arith.maximumf %15, %16 : vector<8x128xf32>
    %18 = arith.truncf %17 : vector<8x128xf32> to vector<8x128xbf16>
    %19 = vector.extract_strided_slice %12 {offsets = [0, 128], sizes = [8, 128], strides = [1, 1]} : vector<8x256xf32> to vector<8x128xf32>
    %20 = vector.broadcast %5 : vector<1x128xf32> to vector<8x128xf32>
    %21 = arith.addf %19, %20 : vector<8x128xf32>
    %c0_15 = arith.constant 0 : index
    %c0_16 = arith.constant 0 : index
    %22 = vector.load %arg4[%c0_15, %c0_16] : memref<128x128xbf16, #tpu.memory_space<vmem>>, vector<128x128xbf16>
    %cst_17 = arith.constant dense<0.000000e+00> : vector<8x128xf32>
    %23 = tpu.matmul %18, %22, %cst_17 {dimension_numbers = #tpu.dot_dimension_numbers<[1], [0], [0], [1], [0, 0, 1, 1], [], []>} : vector<8x128xbf16>, vector<128x128xbf16>, vector<8x128xf32> -> vector<8x128xf32>
    %24 = vector.broadcast %3 : vector<1x128xf32> to vector<8x128xf32>
    %25 = arith.addf %23, %24 : vector<8x128xf32>
    %cst_18 = arith.constant 0.000000e+00 : f32
    %26 = vector.broadcast %cst_18 : f32 to vector<8x128xf32>
    %27 = arith.maximumf %25, %26 : vector<8x128xf32>
    %28 = arith.truncf %27 : vector<8x128xf32> to vector<8x128xbf16>
    %cst_19 = arith.constant dense<0.000000e+00> : vector<8x32xf32>
    %29 = tpu.matmul %28, %9, %cst_19 {dimension_numbers = #tpu.dot_dimension_numbers<[1], [0], [0], [1], [0, 0, 1, 1], [], []>} : vector<8x128xbf16>, vector<128x32xbf16>, vector<8x32xf32> -> vector<8x32xf32>
    %30 = vector.broadcast %4 : vector<1x32xf32> to vector<8x32xf32>
    %31 = arith.addf %29, %30 : vector<8x32xf32>
    %32 = vector.extract_strided_slice %31 {offsets = [0, 0], sizes = [8, 16], strides = [1, 1]} : vector<8x32xf32> to vector<8x16xf32>
    %33 = vector.extract_strided_slice %31 {offsets = [0, 16], sizes = [8, 16], strides = [1, 1]} : vector<8x32xf32> to vector<8x16xf32>
    %cst_20 = arith.constant 5.000000e-01 : f32
    %34 = vector.broadcast %cst_20 : f32 to vector<8x16xf32>
    %35 = arith.mulf %33, %34 : vector<8x16xf32>
    %36 = math.exp %35 : vector<8x16xf32>
    %37 = arith.mulf %1, %36 : vector<8x16xf32>
    %38 = arith.addf %32, %37 : vector<8x16xf32>
    %39 = arith.truncf %38 : vector<8x16xf32> to vector<8x16xbf16>
    %c0_21 = arith.constant 0 : index
    %c0_22 = arith.constant 0 : index
    %40 = vector.load %arg5[%c0_21, %c0_22] : memref<16x128xbf16, #tpu.memory_space<vmem>>, vector<16x128xbf16>
    %cst_23 = arith.constant dense<0.000000e+00> : vector<8x128xf32>
    %41 = tpu.matmul %39, %40, %cst_23 {dimension_numbers = #tpu.dot_dimension_numbers<[1], [0], [0], [1], [0, 0, 1, 1], [], []>} : vector<8x16xbf16>, vector<16x128xbf16>, vector<8x128xf32> -> vector<8x128xf32>
    %42 = arith.addf %41, %21 : vector<8x128xf32>
    %cst_24 = arith.constant 0.000000e+00 : f32
    %43 = vector.broadcast %cst_24 : f32 to vector<8x128xf32>
    %44 = arith.maximumf %42, %43 : vector<8x128xf32>
    %45 = arith.truncf %44 : vector<8x128xf32> to vector<8x128xbf16>
    %c0_25 = arith.constant 0 : index
    %c0_26 = arith.constant 0 : index
    %46 = vector.load %arg6[%c0_25, %c0_26] : memref<128x128xbf16, #tpu.memory_space<vmem>>, vector<128x128xbf16>
    %cst_27 = arith.constant dense<0.000000e+00> : vector<8x128xf32>
    %47 = tpu.matmul %45, %46, %cst_27 {dimension_numbers = #tpu.dot_dimension_numbers<[1], [0], [0], [1], [0, 0, 1, 1], [], []>} : vector<8x128xbf16>, vector<128x128xbf16>, vector<8x128xf32> -> vector<8x128xf32>
    %48 = vector.broadcast %6 : vector<1x128xf32> to vector<8x128xf32>
    %49 = arith.addf %47, %48 : vector<8x128xf32>
    %cst_28 = arith.constant 0.000000e+00 : f32
    %50 = vector.broadcast %cst_28 : f32 to vector<8x128xf32>
    %51 = arith.maximumf %49, %50 : vector<8x128xf32>
    %52 = arith.truncf %51 : vector<8x128xf32> to vector<8x128xbf16>
    %cst_29 = arith.constant dense<0.000000e+00> : vector<8x16xf32>
    %53 = tpu.matmul %52, %10, %cst_29 {dimension_numbers = #tpu.dot_dimension_numbers<[1], [0], [0], [1], [0, 0, 1, 1], [], []>} : vector<8x128xbf16>, vector<128x16xbf16>, vector<8x16xf32> -> vector<8x16xf32>
    %54 = vector.broadcast %7 : vector<1x16xf32> to vector<8x16xf32>
    %55 = arith.addf %53, %54 : vector<8x16xf32>
    %56 = vector.extract_strided_slice %55 {offsets = [0, 0], sizes = [8, 8], strides = [1, 1]} : vector<8x16xf32> to vector<8x8xf32>
    %57 = vector.extract_strided_slice %55 {offsets = [0, 8], sizes = [8, 8], strides = [1, 1]} : vector<8x16xf32> to vector<8x8xf32>
    %cst_30 = arith.constant 0.000000e+00 : f32
    %58 = vector.broadcast %cst_30 : f32 to vector<8x8xf32>
    %59 = arith.maximumf %57, %58 : vector<8x8xf32>
    %60 = math.absf %57 : vector<8x8xf32>
    %cst_31 = arith.constant 0.000000e+00 : f32
    %61 = vector.broadcast %cst_31 : f32 to vector<8x8xf32>
    %62 = arith.subf %61, %60 : vector<8x8xf32>
    %63 = math.exp %62 : vector<8x8xf32>
    %64 = math.log1p %63 : vector<8x8xf32>
    %65 = arith.addf %59, %64 : vector<8x8xf32>
    %cst_32 = arith.constant 0.000000e+00 : f32
    %66 = vector.broadcast %cst_32 : f32 to vector<8x80xf32>
    %67 = tpu.concatenate %31, %56, %65, %66 in 1 : vector<8x32xf32>, vector<8x8xf32>, vector<8x8xf32>, vector<8x80xf32> -> vector<8x128xf32>
    %c0_33 = arith.constant 0 : index
    %c0_34 = arith.constant 0 : index
    %68 = vector.load %arg9[%c0_33, %c0_34] : memref<8x128xf32, #tpu.memory_space<vmem>>, vector<8x128xf32>
    tpu.vector_store %arg9[%c0_33, %c0_34], %67 {strides = array<i32>} : memref<8x128xf32, #tpu.memory_space<vmem>>, vector<8x128xf32>,
    return
  }
  func.func @transform_0(%arg0: i32) -> (i32, i32) {
    %c0_i32 = arith.constant 0 : i32
    %c0_i32_0 = arith.constant 0 : i32
    return %arg0, %c0_i32 : i32, i32
  }
  func.func @transform_1(%arg0: i32) -> (i32, i32) {
    %c0_i32 = arith.constant 0 : i32
    %c0_i32_0 = arith.constant 0 : i32
    return %arg0, %c0_i32 : i32, i32
  }
  func.func @transform_2(%arg0: i32) -> (i32, i32) {
    %c0_i32 = arith.constant 0 : i32
    %c0_i32_0 = arith.constant 0 : i32
    %c0_i32_1 = arith.constant 0 : i32
    return %c0_i32, %c0_i32_0 : i32, i32
  }
  func.func @transform_3(%arg0: i32) -> (i32, i32) {
    %c0_i32 = arith.constant 0 : i32
    %c0_i32_0 = arith.constant 0 : i32
    %c0_i32_1 = arith.constant 0 : i32
    return %c0_i32, %c0_i32_0 : i32, i32
  }
  func.func @transform_4(%arg0: i32) -> (i32, i32) {
    %c0_i32 = arith.constant 0 : i32
    %c0_i32_0 = arith.constant 0 : i32
    %c0_i32_1 = arith.constant 0 : i32
    return %c0_i32, %c0_i32_0 : i32, i32
  }
  func.func @transform_5(%arg0: i32) -> (i32, i32) {
    %c0_i32 = arith.constant 0 : i32
    %c0_i32_0 = arith.constant 0 : i32
    %c0_i32_1 = arith.constant 0 : i32
    return %c0_i32, %c0_i32_0 : i32, i32
  }
  func.func @transform_6(%arg0: i32) -> (i32, i32) {
    %c0_i32 = arith.constant 0 : i32
    %c0_i32_0 = arith.constant 0 : i32
    %c0_i32_1 = arith.constant 0 : i32
    return %c0_i32, %c0_i32_0 : i32, i32
  }
  func.func @transform_7(%arg0: i32) -> (i32, i32) {
    %c0_i32 = arith.constant 0 : i32
    %c0_i32_0 = arith.constant 0 : i32
    %c0_i32_1 = arith.constant 0 : i32
    return %c0_i32, %c0_i32_0 : i32, i32
  }
  func.func @transform_8(%arg0: i32) -> (i32, i32) {
    %c0_i32 = arith.constant 0 : i32
    %c0_i32_0 = arith.constant 0 : i32
    return %arg0, %c0_i32 : i32, i32
  }
}

</mosaic_0001>

<bundles_post_ra>
// kernel: tpu_custom_call.1
= control target key start
LH: loop header
LB: loop body
LE: loop exit
PB: predicated region body
PF: predicated region fallthrough
CT: control target
= control target key end

     0   :  { %13 = vsyncpa [#allocation3], 0  ;;  %s993_s0 = inlined_call_operand.hbm [shape: bf16[8,24], index: 0, kind: input, shape index: {}]   ;;  %s994_s1 = inlined_call_operand.hbm [shape: f32[8,16], index: 1, kind: input, shape index: {}]   ;;  %s995_s2 = inlined_call_operand.vmem [shape: bf16[24,256], index: 2, kind: input, shape index: {}]   ;;  %s996_s3 = inlined_call_operand.vmem [shape: bf16[128,128], index: 3, kind: input, shape index: {}]   ;;  %s997_s4 = inlined_call_operand.hbm [shape: bf16[16,128], index: 4, kind: input, shape index: {}]   ;;  %s998_s5 = inlined_call_operand.hbm [shape: bf16[128,128], index: 5, kind: input, shape index: {}]   ;;  %s999_s6 = inlined_call_operand.vmem [shape: bf16[128,48], index: 6, kind: input, shape index: {}]   ;;  %s1000_s7 = inlined_call_operand.hbm [shape: f32[8,128], index: 7, kind: input, shape index: {}]   ;;  %s1001_s8 = inlined_call_operand.hbm [shape: f32[8,128], index: 8, kind: output, shape index: {}]  }
   0x1   :  { %14 = vsyncpa [#allocation6], 0 }
   0x2   :  { %15 = vsyncpa [#allocation9], 0  ;;  %s33_s29 = sshll.u32 %s994_s1, 4  ;;  %s34_s29 = int_to_ptr.hbm [resolvable:$true] %s33_s29 }
   0x3   :  { %16 = vsyncpa [#allocation4], 0  ;;  %s847_s30 = smov [#allocation5]   ;;  %s60_s12 = sshll.u32 %s998_s5, 4  ;;  %s61_s12 = int_to_ptr.hbm [resolvable:$true] %s60_s12 }
   0x4   :  { %s35_s9 = sshll.u32 %s847_s30, 4  ;;  %s848_s13 = smov [#allocation8]   ;;  %s36_s9 = int_to_ptr.vmem [resolvable:$true] %s35_s9 }
   0x5   :  { %38 = dma.hbm_to_vmem [thread:$0]  %s34_s29, 128, %s36_s9, [#allocation6]  }
   0x6   :  { %s62_s14 = sshll.u32 %s848_s13, 4  ;;  %s22_s17 = sshll.u32 %s993_s0, 4  ;;  %s63_s14 = int_to_ptr.vmem [resolvable:$true] %s62_s14  ;;  %s23_s17 = int_to_ptr.hbm [resolvable:$true] %s22_s17 }
   0x7   :  { %s849_s1 = smov 64   ;;  %s850_s18 = smov 4  }
   0x8   :  { %68 = dma.hbm_to_vmem [thread:$0]  %s61_s12, 1024, %s63_s14, [#allocation9], %s849_s1, %s849_s1, %s850_s18  }
   0x9   :  { %s47_s21 = sshll.u32 %s997_s4, 4  ;;  %s851_s22 = smov [#allocation2]   ;;  %s48_s21 = int_to_ptr.hbm [resolvable:$true] %s47_s21 }
   0xa   :  { %s24_s23 = sshll.u32 %s851_s22, 4  ;;  %s852_s5 = smov [#allocation7]   ;;  %s25_s23 = int_to_ptr.vmem [resolvable:$true] %s24_s23 }
   0xb   :  { %27 = dma.hbm_to_vmem [thread:$0]  %s23_s17, 64, %s25_s23, [#allocation3]  }
   0xc   :  { %s49_s24 = sshll.u32 %s852_s5, 4  ;;  %s76_s0 = sshll.u32 %s1000_s7, 4  ;;  %s50_s24 = int_to_ptr.vmem [resolvable:$true] %s49_s24  ;;  %s77_s0 = int_to_ptr.hbm [resolvable:$true] %s76_s0 }
   0xd   :  { %55 = dma.hbm_to_vmem [thread:$0]  %s48_s21, 128, %s50_s24, [#allocation6], %s849_s1, %s849_s1, %s850_s18  }
   0xe   :  { %s853_s27 = smov [#allocation10]  }
   0xf   :  { %s78_s28 = sshll.u32 %s853_s27, 4  ;;  %s79_s28 = int_to_ptr.vmem [resolvable:$true] %s78_s28 }
  0x10   :  { %81 = dma.hbm_to_vmem [thread:$0]  %s77_s0, 128, %s79_s28, [#allocation9]  }
  0x11   :  { %839 = dma.done.wait [#allocation3], 64  }
  0x12   :  { %840 = vsyncadd [#allocation3], 4294967232 }
  0x13   :  { %841 = dma.done.wait [#allocation6], 256  }
  0x14   :  { %842 = vsyncadd [#allocation6], 4294967040 }
  0x15   :  { %843 = dma.done.wait [#allocation9], 1152  }
  0x16   :  { %844 = vsyncadd [#allocation9], 4294966144  ;;  %v129_v0 = vld [vmem:[%s995_s2 + $0x10] sm:$0xff]  ;;  %vm149_vm0 = vcmask 1043456   ;;  %v536_v2 = vld [vmem:[%s995_s2] sm:$0xf] }
  0x17   :  { %v137_v1 = vunpack.c.l.b16 %v129_v0  ;;  %v654_v4 = vld [vmem:[%s995_s2 + $0x4] sm:$0xf0]  ;;  %v662_v7 = vld [vmem:[%s996_s3 + $0x38] sm:$0xff]  ;;  %v103_v8 = vld [vmem:[#allocation2] sm:$0xf]  ;;  %vm145_vm1 = vcmask 195584   ;;  %v138_v36 = vunpack.c.h.b16 %v129_v0 }
  0x18   :  { %v537_v6 = vor.u32 %v654_v4, %v536_v2  ;;  %v661_v9 = vld [vmem:[%s996_s3 + $0x30] sm:$0xff]  ;;  %v660_v10 = vld [vmem:[%s996_s3 + $0x28] sm:$0xff]  ;;  %v659_v11 = vld [vmem:[%s996_s3 + $0x20] sm:$0xff]  ;;  %vm348_vm2 = vcmask 130048   ;;  %s856_s18 = smov 32   ;;  %vm508_vm4 = vcmask 261120  }
  0x19   :  { %v141_v3 = vpack.c.b16 %v137_v1, %v137_v1  ;;  %v658_v12 = vld [vmem:[%s996_s3 + $0x18] sm:$0xff]  ;;  %v657_v13 = vld [vmem:[%s996_s3 + $0x10] sm:$0xff]  ;;  %v656_v14 = vld [vmem:[%s996_s3 + $0x8] sm:$0xff]  ;;  %v142_v37 = vpack.c.b16 %v138_v36, %v138_v36  ;;  %vm510_vm5 = vcmask 326656   ;;  %s857_s19 = smov [#allocation11]   ;;  %s522_s23 = sshll.u32 %s1001_s8, 4  ;;  %s523_s23 = int_to_ptr.hbm [resolvable:$true] %s522_s23 }
  0x1a   :  { %v655_v15 = vld [vmem:[%s996_s3] sm:$0xff]  ;;  %v652_v16 = vld [vmem:[%s999_s6 + $0x38] sm:$0xff]  ;;  %v651_v17 = vld [vmem:[%s999_s6 + $0x30] sm:$0xff]  ;;  %s520_s20 = sshll.u32 %s857_s19, 4  ;;  %vm512_vm6 = vcmask 392192   ;;  %s521_s20 = int_to_ptr.vmem [resolvable:$true] %s520_s20 }
  0x1b   :  { %v151_v5 = vsel %vm149_vm0, %v141_v3, 0  ;;  %317 = vmatpush.bf16.msra.mxu3 %v652_v16  ;;  %v650_v18 = vld [vmem:[%s999_s6 + $0x28] sm:$0xff]  ;;  %v649_v19 = vld [vmem:[%s999_s6 + $0x20] sm:$0xff]  ;;  %v648_v20 = vld [vmem:[%s999_s6 + $0x18] sm:$0xff]  ;;  %v154_v40 = vsel %vm149_vm0, %v142_v37, 0 }
  0x1c   :  { %162 = vmatpush.bf16.msra.mxu2 %v151_v5  ;;  %v647_v21 = vld [vmem:[%s999_s6 + $0x10] sm:$0xff]  ;;  %v646_v28 = vld [vmem:[%s999_s6 + $0x8] sm:$0xff]  ;;  %v645_v29 = vld [vmem:[%s999_s6] sm:$0xff]  ;;  %175 = vmatpush.bf16.msra.mxu1 %v154_v40  ;;  %s854_s6 = smov 96  }
  0x1d   :  { %v683_v22 = vld [vmem:[#allocation10] ss:$0 sm:$0xff]  ;;  %v684_v30 = vld [vmem:[#allocation10 + $0x1] ss:$0 sm:$0xff]  ;;  %v653_v38 = vld [vmem:[%s995_s2 + $0x4] sm:$0xf]  ;;  %460 = vrot.lane.b32.xlu1 %v651_v17, %s854_s6  ;;  %456 = vrot.lane.b32.xlu2 %v649_v19, %s854_s6 }
  0x1e   :  { %v538_v39 = vld [vmem:[%s995_s2 + $0x8] sm:$0xf0]  ;;  %v685_v42 = vld [vmem:[#allocation10 + $0x2] ss:$0 sm:$0xff]  ;;  %s855_s2 = smov 112   ;;  %v670_v51 = vld [vmem:[#allocation8 + $0x30] sm:$0xff] }
  0x1f   :  { %318 = vmatpush.bf16.msra.mxu3 %v651_v17  ;;  %v541_v41 = vor.u32 %v653_v38, %v538_v39  ;;  %v663_v49 = vld [vmem:[#allocation7] sm:$0xff]  ;;  %v669_v52 = vld [vmem:[#allocation8 + $0x28] sm:$0xff]  ;;  %v668_v53 = vld [vmem:[#allocation8 + $0x20] sm:$0xff] }
  0x20   :  { %163 = vmatpush.bf16.msra.mxu2 %v537_v6  ;;  %359 = vmatpush.bf16.msra.mxu0 %v663_v49  ;;  %v671_v50 = vld [vmem:[#allocation8 + $0x38] sm:$0xff]  ;;  %v666_v56 = vld [vmem:[#allocation8 + $0x10] sm:$0xff]  ;;  %v665_v63 = vld [vmem:[#allocation8 + $0x8] sm:$0xff] }
  0x21   :  { %176 = vmatpush.bf16.msra.mxu1 %v541_v41  ;;  %v667_v54 = vld [vmem:[#allocation8 + $0x18] sm:$0xff]  ;;  %v104_v57 = vld [vmem:[#allocation5] sm:$0xff]  ;;  %v664_v0 = vld [vmem:[#allocation8] sm:$0xff] }
  0x22   :  { %v686_v6 = vld [vmem:[#allocation10 + $0x3] ss:$0 sm:$0xff] }
  0x23   :  { %542 = vmatmul.msk.bf16.vlgmr.msra.gmra.mxu2 %vm145_vm1, %v103_v8  ;;  %319 = vmatpush.bf16.msra.mxu3 %v650_v18 }
  0x24   :  { %253 = vmatpush.bf16.msrb.mxu2 %v662_v7  ;;  %543 = vmatmul.msk.bf16.vlgmr.msra.gmra.mxu1 %vm145_vm1, %v103_v8 }
  0x25   :  { %458 = vrot.lane.b32.xlu1 %v650_v18, %s854_s6  ;;  %454 = vrot.lane.b32.xlu2 %v648_v20, %s854_s6 }
  0x26   :  { %432 = vmatpush.bf16.msrb.mxu1 %v671_v50 }
  0x27   :  { %320 = vmatpush.bf16.msra.mxu3 %v649_v19 }
  0x28   :  { %254 = vmatpush.bf16.msrb.mxu2 %v661_v9 }
  0x2a   :  { %433 = vmatpush.bf16.msrb.mxu1 %v670_v51 }
  0x2b   :  { %321 = vmatpush.bf16.msra.mxu3 %v648_v20 }
  0x2c   :  { %255 = vmatpush.bf16.msrb.mxu2 %v660_v10 }
  0x2d   :  { %450 = vrot.lane.b32.xlu1 %v646_v28, %s854_s6  ;;  %448 = vrot.lane.b32.xlu2 %v645_v29, %s854_s6 }
  0x2e   :  { %434 = vmatpush.bf16.msrb.mxu1 %v669_v52 }
  0x2f   :  { %322 = vmatpush.bf16.msra.mxu3 %v647_v21 }
  0x30   :  { %256 = vmatpush.bf16.msrb.mxu2 %v659_v11 }
  0x32   :  { %435 = vmatpush.bf16.msrb.mxu1 %v668_v53 }
  0x33   :  { %323 = vmatpush.bf16.msra.mxu3 %v646_v28 }
  0x34   :  { %257 = vmatpush.bf16.msrb.mxu2 %v658_v12 }
  0x36   :  { %436 = vmatpush.bf16.msrb.mxu1 %v667_v54 }
  0x37   :  { %324 = vmatpush.bf16.msra.mxu3 %v645_v29 }
  0x38   :  { %258 = vmatpush.bf16.msrb.mxu2 %v657_v13 }
  0x3a   :  { %437 = vmatpush.bf16.msrb.mxu1 %v666_v56 }
  0x3c   :  { %259 = vmatpush.bf16.msrb.mxu2 %v656_v14 }
  0x3e   :  { %438 = vmatpush.bf16.msrb.mxu1 %v665_v63 }
  0x40   :  { %260 = vmatpush.bf16.msrb.mxu2 %v655_v15 }
  0x42   :  { %439 = vmatpush.bf16.msrb.mxu1 %v664_v0 }
  0x77   :  { %v457_v3 = vpop.permute.xlu2 %456 }
  0x7f   :  { %v455_v5 = vpop.permute.xlu2 %454 }
  0x87   :  { %v449_v15 = vpop.permute.xlu2 %448 }
  0x8f   :  { %v461_v1 = vpop.permute.xlu1 %460 }
  0x97   :  { %v459_v4 = vpop.permute.xlu1 %458 }
  0x9f   :  { %v451_v9 = vpop.permute.xlu1 %450 }
  0xa1   :  { %v178_v55 = vpop.f32.mrf.mxu1 }
  0xa2   :  { %v187_v8 = vadd.f32 %v686_v6, %v178_v55 }
  0xa6   :  { %v165_v23 = vpop.f32.mrf.mxu2 }
  0xa7   :  { %v183_v24 = vadd.f32 %v683_v22, %v165_v23  ;;  %v688_v22 = vld [vmem:[#allocation10 + $0x5] ss:$0 sm:$0xff] }
  0xa9   :  { %v184_v25 = vmax.f32 %v183_v24, 0.0  ;;  %v180_v58 = vpop.f32.mrf.mxu1 }
  0xab   :  { %v185_v26 = vpack.c.bf16 %v184_v25, %v184_v25 }
  0xad   :  { %261 = vmatmul.bf16.vlgmr.msrb.gmra.mxu2 %v185_v26 }
  0xae   :  { %v167_v27 = vpop.f32.mrf.mxu2 }
 0x130   :  { %v262_v31 = vpop.f32.mrf.mxu2 }
 0x131   :  { %v263_v32 = vadd.f32 %v684_v30, %v262_v31 }
 0x133   :  { %v266_v33 = vmax.f32 %v263_v32, 0.0 }
 0x135   :  { %v267_v34 = vpack.c.bf16 %v266_v33, %v266_v33 }
 0x137   :  { %325 = vmatmul.bf16.vlgmr.msra.gmra.mxu3 %v267_v34 }
 0x138   :  { %v264_v35 = vpop.f32.mrf.mxu2 }
 0x1ba   :  { %v326_v43 = vpop.f32.mrf.mxu3 }
 0x1bb   :  { %v985_v44 = vadd.f32 %v685_v42, %v326_v43 }
 0x1bd   :  { %v330_v45 = vmul.f32 0.5, %v985_v44 }
 0x1bf   :  { %v331_v46 = vmul.f32 1.442695, %v330_v45 }
 0x1c1   :  { %689 = vpow2.f32 %v331_v46 }
 0x1c2   :  { %v328_v47 = vpop.f32.mrf.mxu3 }
 0x1c7   :  { %v690_v48 = vpop.eup %689 }
 0x1c8   :  { %334 = vrot.lane.b32.xlu0 %v690_v48, %s855_s2 }
 0x1d0   :  { %462 = vrot.lane.b32.xlu0 %v652_v16, %s854_s6  ;;  %v687_v16 = vld [vmem:[#allocation10 + $0x4] ss:$0 sm:$0xff] }
 0x1d8   :  { %452 = vrot.lane.b32.xlu0 %v647_v21, %s854_s6 }
 0x23a   :  { %v335_v59 = vpop.permute.xlu0 %334 }
 0x23b   :  { %v337_v60 = vmul.f32 %v335_v59, %v104_v57 }
 0x23d   :  { %v338_v61 = vadd.f32 %v337_v60, %v985_v44 }
 0x23f   :  { %v339_v62 = vpack.c.bf16 %v338_v61, %v338_v61 }
 0x241   :  { %612 = vmatmul.msk.bf16.vlgmr.msra.gmra.mxu0 %vm348_vm2, %v339_v62 }
 0x242   :  { %v463_v2 = vpop.permute.xlu0 %462 }
 0x243   :  { %472 = vmatpush.bf16.msrb.mxu0 %v463_v2 }
 0x247   :  { %473 = vmatpush.bf16.msrb.mxu0 %v461_v1 }
 0x24a   :  { %v453_v7 = vpop.permute.xlu0 %452 }
 0x24b   :  { %474 = vmatpush.bf16.msrb.mxu0 %v459_v4 }
 0x24f   :  { %475 = vmatpush.bf16.msrb.mxu0 %v457_v3 }
 0x253   :  { %476 = vmatpush.bf16.msrb.mxu0 %v455_v5 }
 0x257   :  { %477 = vmatpush.bf16.msrb.mxu0 %v453_v7 }
 0x25b   :  { %478 = vmatpush.bf16.msrb.mxu0 %v451_v9 }
 0x25f   :  { %479 = vmatpush.bf16.msrb.mxu0 %v449_v15 }
 0x2be   :  { %v361_v10 = vpop.f32.mrf.mxu0 }
 0x2bf   :  { %v362_v11 = vadd.f32 %v361_v10, %v187_v8 }
 0x2c1   :  { %v365_v12 = vmax.f32 %v362_v11, 0.0 }
 0x2c3   :  { %v366_v13 = vpack.c.bf16 %v365_v12, %v365_v12 }
 0x2c5   :  { %440 = vmatmul.bf16.vlgmr.msrb.gmra.mxu1 %v366_v13 }
 0x2c6   :  { %v363_v14 = vpop.f32.mrf.mxu0 }
 0x342   :  { %v441_v17 = vpop.f32.mrf.mxu1 }
 0x343   :  { %v442_v18 = vadd.f32 %v687_v16, %v441_v17 }
 0x345   :  { %v445_v19 = vmax.f32 %v442_v18, 0.0 }
 0x347   :  { %v446_v20 = vpack.c.bf16 %v445_v19, %v445_v19 }
 0x349   :  { %480 = vmatmul.bf16.vlgmr.msrb.gmra.mxu0 %v446_v20 }
 0x34a   :  { %v443_v21 = vpop.f32.mrf.mxu1 }
 0x3c6   :  { %v481_v23 = vpop.f32.mrf.mxu0 }
 0x3c7   :  { %v482_v24 = vadd.f32 %v688_v22, %v481_v23 }
 0x3c9   :  { %v486_v25 = vand.u32 2147483647, %v482_v24  ;;  %501 = vrot.lane.b32.xlu0 %v482_v24, %s856_s18  ;;  %v485_v37 = vmax.f32 %v482_v24, 0.0 }
 0x3cb   :  { %v487_v26 = vsub.f32 0.0, %v486_v25 }
 0x3cd   :  { %v488_v27 = vmul.f32 1.442695, %v487_v26 }
 0x3ce   :  { %v483_v28 = vpop.f32.mrf.mxu0 }
 0x3cf   :  { %691 = vpow2.f32 %v488_v27 }
 0x3d5   :  { %v692_v29 = vpop.eup %691 }
 0x3d6   :  { %v490_v30 = vadd.f32 1.0, %v692_v29  ;;  %v493_v31 = vmul.f32 -0.5, %v692_v29  ;;  %v496_v33 = vand.u32 2147483647, %v692_v29 }
 0x3d8   :  { %693 = vlog2.f32 %v490_v30  ;;  %v494_v32 = vadd.f32 1.0, %v493_v31  ;;  %vm497_vm3 = vcmp.lt.f32.partialorder %v496_v33, 0.0004427343 }
 0x3da   :  { %v495_v36 = vmul.f32 %v692_v29, %v494_v32 }
 0x3de   :  { %v694_v34 = vpop.eup %693 }
 0x3df   :  { %v492_v35 = vmul.f32 0.6931472, %v694_v34 }
 0x3e1   :  { %v498_v38 = vsel %vm497_vm3, %v495_v36, %v492_v35 }
 0x3e2   :  { %v499_v39 = vadd.f32 %v498_v38, %v485_v37 }
 0x3e4   :  { %505 = vrot.lane.b32.xlu1 %v499_v39, %s856_s18 }
 0x43b   :  { %v502_v40 = vpop.permute.xlu0 %501 }
 0x43c   :  { %v509_v41 = vsel %vm508_vm4, %v985_v44, %v502_v40 }
 0x456   :  { %v506_v42 = vpop.permute.xlu1 %505 }
 0x457   :  { %v511_v43 = vsel %vm510_vm5, %v509_v41, %v506_v42 }
 0x458   :  { %v513_v45 = vsel %vm512_vm6, %v511_v43, 0.0 }
 0x459   :  { %514 = vst [vmem:[#allocation11] sm:$0xff] %v513_v45 }
 0x45a   :  { %525 = dma.vmem_to_hbm [thread:$0]  %s521_s20, 128, %s523_s23, [#allocation4]  }
 0x45b   :  { %845 = dma.done.wait [#allocation4], 128  }
 0x45c   :  { %846 = vsyncadd [#allocation4], 4294967168 }
 0x45d   :  { %530 = vsyncpa [#allocation3], 1 }
 0x45e   :  { %531 = vsyncpa [#allocation6], 1 }
 0x45f   :  { %532 = vsyncpa [#allocation9], 1 }
 0x460   :  { %533 = vsyncpa [#allocation4], 1 }

</bundles_post_ra>
